<compile_context>
chip_gen: v6e
topology: v6e:2x2x1
jax: 0.10.0
libtpu: 0.0.40
codegen_flags: <defaults>
</compile_context>

<pallas_src>
import functools

import jax
import jax.numpy as jnp
from jax.experimental import pallas as pl
from jax.experimental.pallas import tpu as pltpu


def _round_up(x, m):
    return (x + m - 1) // m * m


def im2col_3x3(x_nchw):
    """3x3 / pad=1 im2col.  Column order is (c-major, tap-minor), matching
    torch's conv_w.reshape(C_out, C_in*9)."""
    B, C, H, W = x_nchw.shape
    xp = jnp.pad(x_nchw, ((0, 0), (0, 0), (1, 1), (1, 1)))
    cols = [xp[:, :, dh:dh + H, dw:dw + W] for dh in range(3) for dw in range(3)]
    patches = jnp.stack(cols, axis=2).reshape(B, C * 9, H, W)
    patches = patches.transpose(0, 2, 3, 1).reshape(B * H * W, C * 9)
    return patches


# ---------------------------------------------------------------------------
# Kernel 1: conv (im2col matmul) + bias + ReLU + fused global average pool.
# One grid step handles TB images; pooled features are a per-step output
# block, so the grid axis carries no cross-step state and can be "parallel".
# ---------------------------------------------------------------------------
def _conv_pool_kernel(p_ref, w1_ref, b1_ref, pooled_ref, *, TB, HW):
    # (TB*HW, K) bf16 x (K, CF_pad) bf16 -> f32 accumulation on the MXU
    acc = jnp.dot(p_ref[...], w1_ref[...], preferred_element_type=jnp.float32)
    acc = jnp.maximum(acc + b1_ref[...], 0.0)               # [TB*HW, CF_pad]
    # global average pool; reshape only splits the leading (sublane) dim,
    # the lane dim is untouched.
    pooled_ref[...] = jnp.mean(acc.reshape(TB, HW, acc.shape[-1]), axis=1)


# ---------------------------------------------------------------------------
# Kernel 2: tiny head -- linear (+ cross-entropy when training).
# bf16 operands with f32 accumulation; one-hot built in-kernel from int32
# labels via an iota compare.  LSE kept in f32 (padded-class mask = -1e30).
# ---------------------------------------------------------------------------
def _head_kernel(feat_ref, w2_ref, b2_ref, *rest, NC, B, with_loss):
    if with_loss:
        lab_ref, loss_ref = rest
    else:
        (logits_ref,) = rest

    feat = feat_ref[...].astype(jnp.bfloat16)               # [B, CF_pad]
    logits = jnp.dot(feat, w2_ref[...],
                     preferred_element_type=jnp.float32) + b2_ref[...]

    if with_loss:
        col = jax.lax.broadcasted_iota(jnp.int32, logits.shape, 1)
        masked = jnp.where(col < NC, logits, -1e30)          # kill padded classes
        m = jnp.max(masked, axis=-1, keepdims=True)
        lse = m + jnp.log(jnp.sum(jnp.exp(masked - m), axis=-1, keepdims=True))
        onehot = (col == lab_ref[...]).astype(jnp.float32)   # iota == label
        ce = jnp.sum((lse - masked) * onehot, axis=-1, keepdims=True)  # [B,1]
        loss_ref[0, 0] = jnp.sum(ce) * (1.0 / B)
    else:
        logits_ref[...] = logits


# ---------------------------------------------------------------------------
# Wrapper mirroring class_model.forward
# ---------------------------------------------------------------------------
def class_model_forward(params, data, is_training=True):
    if is_training:
        x, labels = data[0], data[1]
    else:
        x, labels = data, None

    B, C_in, H, W = x.shape
    C_feat = params["conv_w"].shape[0]
    NC = params["fc_w"].shape[0]
    HW = H * W
    K = C_in * 9

    CF_pad = _round_up(C_feat, 128)
    NC_pad = _round_up(NC, 128)

    # im2col (K left at 36: the patches stream dominates HBM traffic, so no
    # lane padding of this array).
    patches = im2col_3x3(x).astype(jnp.bfloat16)             # [B*HW, K]

    w1 = params["conv_w"].reshape(C_feat, K).T               # [K, C_feat]
    w1 = jnp.pad(w1, ((0, 0), (0, CF_pad - C_feat))).astype(jnp.bfloat16)
    b1 = jnp.pad(params["conv_b"], (0, CF_pad - C_feat)).reshape(1, CF_pad).astype(jnp.float32)

    # Images per grid step.  TB == B keeps every block dim equal to the full
    # array dim at toy sizes; for large batches pick a TB that is a multiple
    # of 8 and divides B (and keeps 2 double-buffered (TB*HW, K) bf16 tiles
    # under the VMEM limit below).
    TB = B
    nsteps = B // TB

    pooled = pl.pallas_call(
        functools.partial(_conv_pool_kernel, TB=TB, HW=HW),
        grid=(nsteps,),
        in_specs=[
            pl.BlockSpec((TB * HW, K), lambda i: (i, 0)),     # patches (unpadded K)
            pl.BlockSpec((K, CF_pad), lambda i: (0, 0)),      # conv weight
            pl.BlockSpec((1, CF_pad), lambda i: (0, 0)),      # conv bias
        ],
        out_specs=pl.BlockSpec((TB, CF_pad), lambda i: (i, 0)),
        out_shape=jax.ShapeDtypeStruct((B, CF_pad), jnp.float32),
        compiler_params=pltpu.CompilerParams(
            dimension_semantics=("parallel",),                # no cross-step state
            vmem_limit_bytes=32 * 1024 * 1024,                # explicit, v7x-safe
        ),
    )(patches, w1, b1)

    w2 = jnp.pad(params["fc_w"].T,
                 ((0, CF_pad - C_feat), (0, NC_pad - NC))).astype(jnp.bfloat16)
    b2 = jnp.pad(params["fc_b"], (0, NC_pad - NC)).reshape(1, NC_pad).astype(jnp.float32)

    head_in_specs = [
        pl.BlockSpec((B, CF_pad), lambda i: (0, 0)),
        pl.BlockSpec((CF_pad, NC_pad), lambda i: (0, 0)),
        pl.BlockSpec((1, NC_pad), lambda i: (0, 0)),
    ]

    if is_training:
        lab = labels.astype(jnp.int32).reshape(B, 1)
        head_in_specs.append(pl.BlockSpec((B, 1), lambda i: (0, 0)))
        loss = pl.pallas_call(
            functools.partial(_head_kernel, NC=NC, B=B, with_loss=True),
            grid=(1,),
            in_specs=head_in_specs,
            out_specs=pl.BlockSpec(memory_space=pltpu.MemorySpace.SMEM),
            out_shape=jax.ShapeDtypeStruct((1, 1), jnp.float32),
            compiler_params=pltpu.CompilerParams(dimension_semantics=("arbitrary",)),
        )(pooled, w2, b2, lab)
        return loss[0, 0]

    logits = pl.pallas_call(
        functools.partial(_head_kernel, NC=NC, B=B, with_loss=False),
        grid=(1,),
        in_specs=head_in_specs,
        out_specs=pl.BlockSpec((B, NC_pad), lambda i: (0, 0)),
        out_shape=jax.ShapeDtypeStruct((B, NC_pad), jnp.float32),
        compiler_params=pltpu.CompilerParams(dimension_semantics=("arbitrary",)),
    )(pooled, w2, b2)
    return logits[:, :NC]


def make_params(key, c_in=4, c_feat=32, class_num=10):
    k1, k2, k3, k4 = jax.random.split(key, 4)
    return {
        "conv_w": jax.random.normal(k1, (c_feat, c_in, 3, 3), jnp.float32) * 0.1,
        "conv_b": jax.random.normal(k2, (c_feat,), jnp.float32) * 0.01,
        "fc_w": jax.random.normal(k3, (class_num, c_feat), jnp.float32) * 0.1,
        "fc_b": jax.random.normal(k4, (class_num,), jnp.float32) * 0.01,
    }


if __name__ == "__main__":
    B, C_in, H, W = 2, 4, 16, 16
    class_num = 10

    key = jax.random.PRNGKey(0)
    kx, kl, kp = jax.random.split(key, 3)

    x = jax.random.normal(kx, (B, C_in, H, W), jnp.float32)
    labels = jax.random.randint(kl, (B,), 0, class_num, dtype=jnp.int32)
    params = make_params(kp, c_in=C_in, c_feat=32, class_num=class_num)

    # training path: forward((images, labels)) -> scalar loss
    loss = class_model_forward(params, (x, labels), is_training=True)
    loss = jax.block_until_ready(loss)

    # inference path: forward(images) -> logits
    pred = class_model_forward(params, x, is_training=False)
    pred = jax.block_until_ready(pred)

    assert jnp.isfinite(loss)
    assert pred.shape == (B, class_num)
    print("KERNEL_OK")
</pallas_src>

<mosaic_0001>
module attributes {stable_mosaic.version = 11 : i64} {
  func.func @_conv_pool_kernel(%arg0: i32, %arg1: memref<512x36xbf16, #tpu.memory_space<vmem>>, %arg2: memref<36x128xbf16, #tpu.memory_space<vmem>>, %arg3: memref<1x128xf32, #tpu.memory_space<vmem>>, %arg4: memref<2x128xf32, #tpu.memory_space<vmem>>) attributes {dimension_semantics = [#tpu.dimension_semantics<parallel>], iteration_bounds = array<i64: 1>, scalar_prefetch = 0 : i64, scratch_operands = 0 : i64, tpu.core_type = #tpu.core_type<tc>, window_params = [{transform_indices = @transform_0, window_bounds = array<i64: 512, 36>}, {pipeline_mode = #tpu.pipeline_mode<synchronous>, transform_indices = @transform_1, window_bounds = array<i64: 36, 128>}, {pipeline_mode = #tpu.pipeline_mode<synchronous>, transform_indices = @transform_2, window_bounds = array<i64: 1, 128>}, {transform_indices = @transform_3, window_bounds = array<i64: 2, 128>}]} {
    %c0 = arith.constant 0 : index
    %c0_0 = arith.constant 0 : index
    %0 = vector.load %arg1[%c0, %c0_0] : memref<512x36xbf16, #tpu.memory_space<vmem>>, vector<512x36xbf16>
    %c0_1 = arith.constant 0 : index
    %c0_2 = arith.constant 0 : index
    %1 = vector.load %arg2[%c0_1, %c0_2] : memref<36x128xbf16, #tpu.memory_space<vmem>>, vector<36x128xbf16>
    %cst = arith.constant dense<0.000000e+00> : vector<512x128xf32>
    %2 = tpu.matmul %0, %1, %cst {dimension_numbers = #tpu.dot_dimension_numbers<[1], [0], [0], [1], [0, 0, 1, 1], [], []>} : vector<512x36xbf16>, vector<36x128xbf16>, vector<512x128xf32> -> vector<512x128xf32>
    %c0_3 = arith.constant 0 : index
    %c0_4 = arith.constant 0 : index
    %3 = vector.load %arg3[%c0_3, %c0_4] : memref<1x128xf32, #tpu.memory_space<vmem>>, vector<1x128xf32>
    %4 = vector.broadcast %3 : vector<1x128xf32> to vector<512x128xf32>
    %5 = arith.addf %2, %4 : vector<512x128xf32>
    %cst_5 = arith.constant 0.000000e+00 : f32
    %6 = vector.broadcast %cst_5 : f32 to vector<512x128xf32>
    %7 = arith.maximumf %5, %6 : vector<512x128xf32>
    %8 = vector.shape_cast %7 : vector<512x128xf32> to vector<2x256x128xf32>
    %cst_6 = arith.constant dense<0.000000e+00> : vector<2x128xf32>
    %9 = vector.multi_reduction <add>, %8, %cst_6 [1] : vector<2x256x128xf32> to vector<2x128xf32>
    %cst_7 = arith.constant 2.560000e+02 : f32
    %10 = vector.broadcast %cst_7 : f32 to vector<2x128xf32>
    %11 = arith.divf %9, %10 : vector<2x128xf32>
    %c0_8 = arith.constant 0 : index
    %c0_9 = arith.constant 0 : index
    %12 = vector.load %arg4[%c0_8, %c0_9] : memref<2x128xf32, #tpu.memory_space<vmem>>, vector<2x128xf32>
    tpu.vector_store %arg4[%c0_8, %c0_9], %11 {strides = array<i32>} : memref<2x128xf32, #tpu.memory_space<vmem>>, vector<2x128xf32>,
    return
  }
  func.func @transform_0(%arg0: i32) -> (i32, i32) {
    %c0_i32 = arith.constant 0 : i32
    %c0_i32_0 = arith.constant 0 : i32
    return %arg0, %c0_i32 : i32, i32
  }
  func.func @transform_1(%arg0: i32) -> (i32, i32) {
    %c0_i32 = arith.constant 0 : i32
    %c0_i32_0 = arith.constant 0 : i32
    %c0_i32_1 = arith.constant 0 : i32
    return %c0_i32, %c0_i32_0 : i32, i32
  }
  func.func @transform_2(%arg0: i32) -> (i32, i32) {
    %c0_i32 = arith.constant 0 : i32
    %c0_i32_0 = arith.constant 0 : i32
    %c0_i32_1 = arith.constant 0 : i32
    return %c0_i32, %c0_i32_0 : i32, i32
  }
  func.func @transform_3(%arg0: i32) -> (i32, i32) {
    %c0_i32 = arith.constant 0 : i32
    %c0_i32_0 = arith.constant 0 : i32
    return %arg0, %c0_i32 : i32, i32
  }
}

</mosaic_0001>

<bundles_post_ra>
// kernel: tpu_custom_call.1
= control target key start
LH: loop header
LB: loop body
LE: loop exit
PB: predicated region body
PF: predicated region fallthrough
CT: control target
= control target key end

     0   :  { %vm364_vm0 = vcmask 1041408   ;;  %vm267_vm1 = vcmask 293888   ;;  %s1287_s0 = inlined_call_operand.vmem [shape: bf16[512,36], index: 0, kind: input, shape index: {}]   ;;  %s1288_s1 = inlined_call_operand.vmem [shape: bf16[36,128], index: 1, kind: input, shape index: {}]   ;;  %s1289_s2 = inlined_call_operand.vmem [shape: f32[1,128], index: 2, kind: input, shape index: {}]   ;;  %s1290_s3 = inlined_call_operand.hbm [shape: f32[2,128], index: 3, kind: output, shape index: {}]  }
   0x1   :  { %v1000_v0 = vld [vmem:[%s1288_s1 + $0x10] ss:$0 sps:$4 sm:$0x33]   ;;  %v1001_v1 = vld [vmem:[%s1288_s1 + $0x8] sm:$0xff]   ;;  %v1002_v3 = vld [vmem:[%s1288_s1] sm:$0xff]  }
   0x2   :  { %997 = vmatprep.subr.msk.bf16.mxu0 %vm364_vm0, %v1000_v0  ;;  %998 = vmatprep.subr.msk.bf16.mxu1 %vm364_vm0, %v1000_v0  ;;  %v366_v2 = vsel %vm364_vm0, %v1000_v0, 0  ;;  %v1003_v4 = vld [vmem:[%s1287_s0] sm:$0xff]   ;;  %v1005_v6 = vld [vmem:[%s1287_s0 + $0x8] sm:$0xff]   ;;  %v1007_v8 = vld [vmem:[%s1287_s0 + $0x10] sm:$0xff]  }
   0x3   :  { %922 = vmatpush3.bf16.msra.mxu0 %v366_v2  ;;  %994 = vmatpush3.bf16.msra.mxu1 %v366_v2  ;;  %v1004_v5 = vld [vmem:[%s1287_s0 + $0x80] sm:$0xff]   ;;  %v1006_v7 = vld [vmem:[%s1287_s0 + $0x88] sm:$0xff]   ;;  %v1008_v9 = vld [vmem:[%s1287_s0 + $0x90] sm:$0xff]  }
   0x4   :  { %923 = vmatprep.subr.bf16.mxu0 %v1001_v1  ;;  %992 = vmatprep.subr.bf16.mxu1 %v1001_v1  ;;  %v1009_v10 = vld [vmem:[%s1287_s0 + $0x18] sm:$0xff]   ;;  %v1011_v12 = vld [vmem:[%s1287_s0 + $0x20] sm:$0xff]   ;;  %v1013_v14 = vld [vmem:[%s1287_s0 + $0x28] sm:$0xff]  }
   0x5   :  { %927 = vmatprep.mubr.msk.bf16.mxu0 %vm267_vm1, %v1003_v4  ;;  %959 = vmatprep.mubr.msk.bf16.mxu1 %vm267_vm1, %v1004_v5  ;;  %v1010_v11 = vld [vmem:[%s1287_s0 + $0x98] sm:$0xff]   ;;  %v1012_v13 = vld [vmem:[%s1287_s0 + $0xa0] sm:$0xff]   ;;  %v1014_v15 = vld [vmem:[%s1287_s0 + $0xa8] sm:$0xff]  }
   0x6   :  { %v1015_v16 = vld [vmem:[%s1287_s0 + $0x30] sm:$0xff]   ;;  %v1017_v18 = vld [vmem:[%s1287_s0 + $0x38] sm:$0xff]   ;;  %v1019_v20 = vld [vmem:[%s1287_s0 + $0x40] sm:$0xff]  }
   0x7   :  { %924 = vmatpush3.bf16.msra.mxu0 %v1001_v1  ;;  %995 = vmatpush3.bf16.msra.mxu1 %v1001_v1  ;;  %v1016_v17 = vld [vmem:[%s1287_s0 + $0xb0] sm:$0xff]   ;;  %v1018_v19 = vld [vmem:[%s1287_s0 + $0xb8] sm:$0xff]   ;;  %v1020_v21 = vld [vmem:[%s1287_s0 + $0xc0] sm:$0xff]  }
   0x8   :  { %925 = vmatprep.subr.bf16.mxu0 %v1002_v3  ;;  %993 = vmatprep.subr.bf16.mxu1 %v1002_v3 }
   0xb   :  { %926 = vmatpush3.bf16.msra.mxu0 %v1002_v3  ;;  %996 = vmatpush3.bf16.msra.mxu1 %v1002_v3 }
   0xe   :  { %928 = vmatmul.mubr.msk.bf16.vlgmr.msra.gmra.mxu0 %vm267_vm1, %v1005_v6  ;;  %960 = vmatmul.mubr.msk.bf16.vlgmr.msra.gmra.mxu1 %vm267_vm1, %v1006_v7 }
   0xf   :  { %931 = vmatprep.mubr.msk.bf16.mxu0 %vm267_vm1, %v1007_v8  ;;  %963 = vmatprep.mubr.msk.bf16.mxu1 %vm267_vm1, %v1008_v9 }
  0x16   :  { %932 = vmatmul.mubr.msk.bf16.gmra.mxu0 %vm267_vm1, %v1009_v10  ;;  %964 = vmatmul.mubr.msk.bf16.gmra.mxu1 %vm267_vm1, %v1010_v11 }
  0x17   :  { %935 = vmatprep.mubr.msk.bf16.mxu0 %vm267_vm1, %v1011_v12  ;;  %967 = vmatprep.mubr.msk.bf16.mxu1 %vm267_vm1, %v1012_v13 }
  0x1e   :  { %936 = vmatmul.mubr.msk.bf16.gmra.mxu0 %vm267_vm1, %v1013_v14  ;;  %968 = vmatmul.mubr.msk.bf16.gmra.mxu1 %vm267_vm1, %v1014_v15 }
  0x1f   :  { %939 = vmatprep.mubr.msk.bf16.mxu0 %vm267_vm1, %v1015_v16  ;;  %971 = vmatprep.mubr.msk.bf16.mxu1 %vm267_vm1, %v1016_v17 }
  0x20   :  { %8 = vsyncpa [#allocation3], 0  ;;  %v1021_v22 = vld [vmem:[%s1287_s0 + $0x48] sm:$0xff]   ;;  %v1023_v24 = vld [vmem:[%s1287_s0 + $0x50] sm:$0xff]   ;;  %vm800_vm2 = vcmask 1041409  }
  0x21   :  { %v1022_v23 = vld [vmem:[%s1287_s0 + $0xc8] sm:$0xff]   ;;  %v1024_v25 = vld [vmem:[%s1287_s0 + $0xd0] sm:$0xff]   ;;  %v1025_v26 = vld [vmem:[%s1287_s0 + $0x58] sm:$0xff]  }
  0x22   :  { %v1026_v27 = vld [vmem:[%s1287_s0 + $0xd8] sm:$0xff]   ;;  %v1027_v28 = vld [vmem:[%s1287_s0 + $0x60] sm:$0xff]   ;;  %v1029_v30 = vld [vmem:[%s1287_s0 + $0x68] sm:$0xff]  }
  0x23   :  { %v1028_v29 = vld [vmem:[%s1287_s0 + $0xe0] sm:$0xff]   ;;  %v1030_v31 = vld [vmem:[%s1287_s0 + $0xe8] sm:$0xff]   ;;  %v1031_v32 = vld [vmem:[%s1287_s0 + $0x70] sm:$0xff]  }
  0x24   :  { %v1032_v33 = vld [vmem:[%s1287_s0 + $0xf0] sm:$0xff]   ;;  %v1033_v34 = vld [vmem:[%s1287_s0 + $0x78] sm:$0xff]   ;;  %v1218_v40 = vld [vmem:[%s1289_s2] ss:$0 sm:$0xff] }
  0x25   :  { %v1034_v35 = vld [vmem:[%s1287_s0 + $0xf8] sm:$0xff]   ;;  %s1057_s0 = smov [#allocation2]  }
  0x26   :  { %940 = vmatmul.mubr.msk.bf16.gmra.mxu0 %vm267_vm1, %v1017_v18  ;;  %972 = vmatmul.mubr.msk.bf16.gmra.mxu1 %vm267_vm1, %v1018_v19  ;;  %s810_s2 = sshll.u32 %s1057_s0, 4  ;;  %s811_s2 = int_to_ptr.vmem [resolvable:$true] %s810_s2 }
  0x27   :  { %943 = vmatprep.mubr.msk.bf16.mxu0 %vm267_vm1, %v1019_v20  ;;  %975 = vmatprep.mubr.msk.bf16.mxu1 %vm267_vm1, %v1020_v21  ;;  %s1035_s27 = scalar_lea.vmem %s811_s2, 32  ;;  %p1040_p1 = scmp.lt.s32.totalorder %s811_s2, %s811_s2 }
  0x28   :  { %p1036_p0 = scmp.ne.s32.totalorder %s811_s2, %s1035_s27  ;;  %p1041_p2 = scmp.lt.s32.totalorder %s1035_s27, %s1035_s27 }
  0x2a   :  { %p1042_p3 = por %p1041_p2, %p1040_p1 }
  0x2c   :  { %p1043_p4 = pnand %p1042_p3, %p1036_p0 }
  0x2e   :  { %944 = vmatmul.mubr.msk.bf16.gmra.mxu0 %vm267_vm1, %v1021_v22  ;;  %976 = vmatmul.mubr.msk.bf16.gmra.mxu1 %vm267_vm1, %v1022_v23 }
  0x2f   :  { %947 = vmatprep.mubr.msk.bf16.mxu0 %vm267_vm1, %v1023_v24  ;;  %979 = vmatprep.mubr.msk.bf16.mxu1 %vm267_vm1, %v1024_v25 }
  0x36   :  { %948 = vmatmul.mubr.msk.bf16.gmra.mxu0 %vm267_vm1, %v1025_v26  ;;  %980 = vmatmul.mubr.msk.bf16.gmra.mxu1 %vm267_vm1, %v1026_v27 }
  0x37   :  { %951 = vmatprep.mubr.msk.bf16.mxu0 %vm267_vm1, %v1027_v28  ;;  %983 = vmatprep.mubr.msk.bf16.mxu1 %vm267_vm1, %v1028_v29 }
  0x3e   :  { %952 = vmatmul.mubr.msk.bf16.gmra.mxu0 %vm267_vm1, %v1029_v30  ;;  %984 = vmatmul.mubr.msk.bf16.gmra.mxu1 %vm267_vm1, %v1030_v31 }
  0x3f   :  { %955 = vmatprep.mubr.msk.bf16.mxu0 %vm267_vm1, %v1031_v32  ;;  %987 = vmatprep.mubr.msk.bf16.mxu1 %vm267_vm1, %v1032_v33 }
  0x46   :  { %956 = vmatmul.mubr.msk.bf16.gmra.mxu0 %vm267_vm1, %v1033_v34  ;;  %988 = vmatmul.mubr.msk.bf16.gmra.mxu1 %vm267_vm1, %v1034_v35 }
  0xce   :  { %v929_v36 = vpop.f32.mrf.mxu0  ;;  %v961_v37 = vpop.f32.mrf.mxu1 }
  0xcf   :  { %v411_v47 = vadd.f32 %v929_v36, %v1218_v40  ;;  %v539_v48 = vadd.f32 %v961_v37, %v1218_v40 }
  0xd0   :  { %v402_v38 = vpop.f32.mrf.mxu0  ;;  %v530_v39 = vpop.f32.mrf.mxu1 }
  0xd1   :  { %v403_v41 = vadd.f32 %v1218_v40, %v402_v38  ;;  %v531_v42 = vadd.f32 %v1218_v40, %v530_v39  ;;  %v659_v61 = vmax.f32 %v411_v47, 0.0  ;;  %v691_v62 = vmax.f32 %v539_v48, 0.0 }
  0xd2   :  { %v930_v43 = vpop.f32.mrf.mxu0  ;;  %v962_v44 = vpop.f32.mrf.mxu1 }
  0xd3   :  { %v657_v51 = vmax.f32 %v403_v41, 0.0  ;;  %v689_v52 = vmax.f32 %v531_v42, 0.0  ;;  %v414_v55 = vadd.f32 %v930_v43, %v1218_v40  ;;  %v542_v56 = vadd.f32 %v962_v44, %v1218_v40 }
  0xd4   :  { %v405_v45 = vpop.f32.mrf.mxu0  ;;  %v533_v46 = vpop.f32.mrf.mxu1 }
  0xd5   :  { %v406_v49 = vadd.f32 %v1218_v40, %v405_v45  ;;  %v534_v50 = vadd.f32 %v1218_v40, %v533_v46  ;;  %v660_v5 = vmax.f32 %v414_v55, 0.0  ;;  %v692_v6 = vmax.f32 %v542_v56, 0.0 }
  0xd6   :  { %v933_v53 = vpop.f32.mrf.mxu0  ;;  %v965_v54 = vpop.f32.mrf.mxu1 }
  0xd7   :  { %v658_v57 = vmax.f32 %v406_v49, 0.0  ;;  %v690_v58 = vmax.f32 %v534_v50, 0.0  ;;  %v427_v9 = vadd.f32 %v933_v53, %v1218_v40  ;;  %v555_v10 = vadd.f32 %v965_v54, %v1218_v40 }
  0xd8   :  { %v418_v59 = vpop.f32.mrf.mxu0  ;;  %v546_v60 = vpop.f32.mrf.mxu1 }
  0xd9   :  { %v721_v63 = vadd.f32 %v658_v57, %v657_v51  ;;  %v758_v0 = vadd.f32 %v690_v58, %v689_v52  ;;  %v419_v1 = vadd.f32 %v1218_v40, %v418_v59  ;;  %v547_v2 = vadd.f32 %v1218_v40, %v546_v60 }
  0xda   :  { %v934_v3 = vpop.f32.mrf.mxu0  ;;  %v966_v4 = vpop.f32.mrf.mxu1  ;;  %v663_v29 = vmax.f32 %v427_v9, 0.0  ;;  %v695_v30 = vmax.f32 %v555_v10, 0.0 }
  0xdb   :  { %v722_v7 = vadd.f32 %v721_v63, %v659_v61  ;;  %v759_v8 = vadd.f32 %v758_v0, %v691_v62  ;;  %v661_v13 = vmax.f32 %v419_v1, 0.0  ;;  %v693_v15 = vmax.f32 %v547_v2, 0.0 }
  0xdc   :  { %v421_v11 = vpop.f32.mrf.mxu0  ;;  %v549_v12 = vpop.f32.mrf.mxu1  ;;  %v430_v23 = vadd.f32 %v934_v3, %v1218_v40  ;;  %v558_v24 = vadd.f32 %v966_v4, %v1218_v40 }
  0xdd   :  { %v723_v14 = vadd.f32 %v722_v7, %v660_v5  ;;  %v760_v16 = vadd.f32 %v759_v8, %v692_v6  ;;  %v422_v17 = vadd.f32 %v1218_v40, %v421_v11  ;;  %v550_v18 = vadd.f32 %v1218_v40, %v549_v12 }
  0xde   :  { %v937_v19 = vpop.f32.mrf.mxu0  ;;  %v969_v20 = vpop.f32.mrf.mxu1  ;;  %v664_v37 = vmax.f32 %v430_v23, 0.0  ;;  %v696_v38 = vmax.f32 %v558_v24, 0.0 }
  0xdf   :  { %v724_v21 = vadd.f32 %v723_v14, %v661_v13  ;;  %v761_v22 = vadd.f32 %v760_v16, %v693_v15  ;;  %v662_v25 = vmax.f32 %v422_v17, 0.0  ;;  %v694_v26 = vmax.f32 %v550_v18, 0.0 }
  0xe0   :  { %v434_v27 = vpop.f32.mrf.mxu0  ;;  %v562_v28 = vpop.f32.mrf.mxu1  ;;  %v443_v44 = vadd.f32 %v937_v19, %v1218_v40  ;;  %v571_v45 = vadd.f32 %v969_v20, %v1218_v40 }
  0xe1   :  { %v725_v31 = vadd.f32 %v724_v21, %v662_v25  ;;  %v762_v32 = vadd.f32 %v761_v22, %v694_v26  ;;  %v435_v33 = vadd.f32 %v1218_v40, %v434_v27  ;;  %v563_v34 = vadd.f32 %v1218_v40, %v562_v28 }
  0xe2   :  { %v938_v35 = vpop.f32.mrf.mxu0  ;;  %v970_v36 = vpop.f32.mrf.mxu1  ;;  %v667_v62 = vmax.f32 %v443_v44, 0.0  ;;  %v699_v63 = vmax.f32 %v571_v45, 0.0 }
  0xe3   :  { %v726_v39 = vadd.f32 %v725_v31, %v663_v29  ;;  %v763_v41 = vadd.f32 %v762_v32, %v695_v30  ;;  %v665_v48 = vmax.f32 %v435_v33, 0.0  ;;  %v697_v50 = vmax.f32 %v563_v34, 0.0 }
  0xe4   :  { %v437_v42 = vpop.f32.mrf.mxu0  ;;  %v565_v43 = vpop.f32.mrf.mxu1  ;;  %v446_v58 = vadd.f32 %v938_v35, %v1218_v40  ;;  %v574_v59 = vadd.f32 %v970_v36, %v1218_v40 }
  0xe5   :  { %v438_v46 = vadd.f32 %v1218_v40, %v437_v42  ;;  %v566_v47 = vadd.f32 %v1218_v40, %v565_v43  ;;  %v727_v49 = vadd.f32 %v726_v39, %v664_v37  ;;  %v764_v51 = vadd.f32 %v763_v41, %v696_v38 }
  0xe6   :  { %v941_v52 = vpop.f32.mrf.mxu0  ;;  %v973_v53 = vpop.f32.mrf.mxu1  ;;  %v668_v6 = vmax.f32 %v446_v58, 0.0  ;;  %v700_v7 = vmax.f32 %v574_v59, 0.0 }
  0xe7   :  { %v666_v54 = vmax.f32 %v438_v46, 0.0  ;;  %v698_v55 = vmax.f32 %v566_v47, 0.0  ;;  %v728_v56 = vadd.f32 %v727_v49, %v665_v48  ;;  %v765_v57 = vadd.f32 %v764_v51, %v697_v50 }
  0xe8   :  { %v450_v60 = vpop.f32.mrf.mxu0  ;;  %v578_v61 = vpop.f32.mrf.mxu1  ;;  %v459_v12 = vadd.f32 %v941_v52, %v1218_v40  ;;  %v587_v13 = vadd.f32 %v973_v53, %v1218_v40 }
  0xe9   :  { %v729_v0 = vadd.f32 %v728_v56, %v666_v54  ;;  %v766_v1 = vadd.f32 %v765_v57, %v698_v55  ;;  %v451_v2 = vadd.f32 %v1218_v40, %v450_v60  ;;  %v579_v3 = vadd.f32 %v1218_v40, %v578_v61 }
  0xea   :  { %v942_v4 = vpop.f32.mrf.mxu0  ;;  %v974_v5 = vpop.f32.mrf.mxu1  ;;  %v671_v30 = vmax.f32 %v459_v12, 0.0  ;;  %v703_v31 = vmax.f32 %v587_v13, 0.0 }
  0xeb   :  { %v730_v8 = vadd.f32 %v729_v0, %v667_v62  ;;  %v767_v9 = vadd.f32 %v766_v1, %v699_v63  ;;  %v669_v16 = vmax.f32 %v451_v2, 0.0  ;;  %v701_v18 = vmax.f32 %v579_v3, 0.0 }
  0xec   :  { %v453_v10 = vpop.f32.mrf.mxu0  ;;  %v581_v11 = vpop.f32.mrf.mxu1  ;;  %v462_v26 = vadd.f32 %v942_v4, %v1218_v40  ;;  %v590_v27 = vadd.f32 %v974_v5, %v1218_v40 }
  0xed   :  { %v454_v14 = vadd.f32 %v1218_v40, %v453_v10  ;;  %v582_v15 = vadd.f32 %v1218_v40, %v581_v11  ;;  %v731_v17 = vadd.f32 %v730_v8, %v668_v6  ;;  %v768_v19 = vadd.f32 %v767_v9, %v700_v7 }
  0xee   :  { %v945_v20 = vpop.f32.mrf.mxu0  ;;  %v977_v21 = vpop.f32.mrf.mxu1  ;;  %v672_v38 = vmax.f32 %v462_v26, 0.0  ;;  %v704_v39 = vmax.f32 %v590_v27, 0.0 }
  0xef   :  { %v670_v22 = vmax.f32 %v454_v14, 0.0  ;;  %v702_v23 = vmax.f32 %v582_v15, 0.0  ;;  %v732_v24 = vadd.f32 %v731_v17, %v669_v16  ;;  %v769_v25 = vadd.f32 %v768_v19, %v701_v18 }
  0xf0   :  { %v466_v28 = vpop.f32.mrf.mxu0  ;;  %v594_v29 = vpop.f32.mrf.mxu1  ;;  %v475_v45 = vadd.f32 %v945_v20, %v1218_v40  ;;  %v603_v46 = vadd.f32 %v977_v21, %v1218_v40 }
  0xf1   :  { %v733_v32 = vadd.f32 %v732_v24, %v670_v22  ;;  %v770_v33 = vadd.f32 %v769_v25, %v702_v23  ;;  %v467_v34 = vadd.f32 %v1218_v40, %v466_v28  ;;  %v595_v35 = vadd.f32 %v1218_v40, %v594_v29 }
  0xf2   :  { %v946_v36 = vpop.f32.mrf.mxu0  ;;  %v978_v37 = vpop.f32.mrf.mxu1  ;;  %v675_v63 = vmax.f32 %v475_v45, 0.0  ;;  %v707_v0 = vmax.f32 %v603_v46, 0.0 }
  0xf3   :  { %v734_v41 = vadd.f32 %v733_v32, %v671_v30  ;;  %v771_v42 = vadd.f32 %v770_v33, %v703_v31  ;;  %v673_v49 = vmax.f32 %v467_v34, 0.0  ;;  %v705_v51 = vmax.f32 %v595_v35, 0.0 }
  0xf4   :  { %v469_v43 = vpop.f32.mrf.mxu0  ;;  %v597_v44 = vpop.f32.mrf.mxu1  ;;  %v478_v59 = vadd.f32 %v946_v36, %v1218_v40  ;;  %v606_v60 = vadd.f32 %v978_v37, %v1218_v40 }
  0xf5   :  { %v470_v47 = vadd.f32 %v1218_v40, %v469_v43  ;;  %v598_v48 = vadd.f32 %v1218_v40, %v597_v44  ;;  %v735_v50 = vadd.f32 %v734_v41, %v672_v38  ;;  %v772_v52 = vadd.f32 %v771_v42, %v704_v39 }
  0xf6   :  { %v949_v53 = vpop.f32.mrf.mxu0  ;;  %v981_v54 = vpop.f32.mrf.mxu1  ;;  %v676_v7 = vmax.f32 %v478_v59, 0.0  ;;  %v708_v8 = vmax.f32 %v606_v60, 0.0 }
  0xf7   :  { %v674_v55 = vmax.f32 %v470_v47, 0.0  ;;  %v706_v56 = vmax.f32 %v598_v48, 0.0  ;;  %v736_v57 = vadd.f32 %v735_v50, %v673_v49  ;;  %v773_v58 = vadd.f32 %v772_v52, %v705_v51 }
  0xf8   :  { %v482_v61 = vpop.f32.mrf.mxu0  ;;  %v610_v62 = vpop.f32.mrf.mxu1  ;;  %v491_v13 = vadd.f32 %v949_v53, %v1218_v40  ;;  %v619_v14 = vadd.f32 %v981_v54, %v1218_v40 }
  0xf9   :  { %v737_v1 = vadd.f32 %v736_v57, %v674_v55  ;;  %v774_v2 = vadd.f32 %v773_v58, %v706_v56  ;;  %v483_v3 = vadd.f32 %v1218_v40, %v482_v61  ;;  %v611_v4 = vadd.f32 %v1218_v40, %v610_v62 }
  0xfa   :  { %v950_v5 = vpop.f32.mrf.mxu0  ;;  %v982_v6 = vpop.f32.mrf.mxu1  ;;  %v679_v31 = vmax.f32 %v491_v13, 0.0  ;;  %v711_v32 = vmax.f32 %v619_v14, 0.0 }
  0xfb   :  { %v738_v9 = vadd.f32 %v737_v1, %v675_v63  ;;  %v775_v10 = vadd.f32 %v774_v2, %v707_v0  ;;  %v677_v17 = vmax.f32 %v483_v3, 0.0  ;;  %v709_v19 = vmax.f32 %v611_v4, 0.0 }
  0xfc   :  { %v485_v11 = vpop.f32.mrf.mxu0  ;;  %v613_v12 = vpop.f32.mrf.mxu1  ;;  %v494_v27 = vadd.f32 %v950_v5, %v1218_v40  ;;  %v622_v28 = vadd.f32 %v982_v6, %v1218_v40 }
  0xfd   :  { %v486_v15 = vadd.f32 %v1218_v40, %v485_v11  ;;  %v614_v16 = vadd.f32 %v1218_v40, %v613_v12  ;;  %v739_v18 = vadd.f32 %v738_v9, %v676_v7  ;;  %v776_v20 = vadd.f32 %v775_v10, %v708_v8 }
  0xfe   :  { %v953_v21 = vpop.f32.mrf.mxu0  ;;  %v985_v22 = vpop.f32.mrf.mxu1  ;;  %v680_v39 = vmax.f32 %v494_v27, 0.0  ;;  %v712_v41 = vmax.f32 %v622_v28, 0.0 }
  0xff   :  { %v678_v23 = vmax.f32 %v486_v15, 0.0  ;;  %v710_v24 = vmax.f32 %v614_v16, 0.0  ;;  %v740_v25 = vadd.f32 %v739_v18, %v677_v17  ;;  %v777_v26 = vadd.f32 %v776_v20, %v709_v19 }
 0x100   :  { %v498_v29 = vpop.f32.mrf.mxu0  ;;  %v626_v30 = vpop.f32.mrf.mxu1  ;;  %v507_v46 = vadd.f32 %v953_v21, %v1218_v40  ;;  %v635_v47 = vadd.f32 %v985_v22, %v1218_v40 }
 0x101   :  { %v741_v33 = vadd.f32 %v740_v25, %v678_v23  ;;  %v778_v34 = vadd.f32 %v777_v26, %v710_v24  ;;  %v499_v35 = vadd.f32 %v1218_v40, %v498_v29  ;;  %v627_v36 = vadd.f32 %v1218_v40, %v626_v30 }
 0x102   :  { %v954_v37 = vpop.f32.mrf.mxu0  ;;  %v986_v38 = vpop.f32.mrf.mxu1  ;;  %v683_v0 = vmax.f32 %v507_v46, 0.0  ;;  %v715_v1 = vmax.f32 %v635_v47, 0.0 }
 0x103   :  { %v742_v42 = vadd.f32 %v741_v33, %v679_v31  ;;  %v779_v43 = vadd.f32 %v778_v34, %v711_v32  ;;  %v681_v50 = vmax.f32 %v499_v35, 0.0  ;;  %v713_v52 = vmax.f32 %v627_v36, 0.0 }
 0x104   :  { %v501_v44 = vpop.f32.mrf.mxu0  ;;  %v629_v45 = vpop.f32.mrf.mxu1  ;;  %v510_v60 = vadd.f32 %v954_v37, %v1218_v40  ;;  %v638_v61 = vadd.f32 %v986_v38, %v1218_v40 }
 0x105   :  { %v502_v48 = vadd.f32 %v1218_v40, %v501_v44  ;;  %v630_v49 = vadd.f32 %v1218_v40, %v629_v45  ;;  %v743_v51 = vadd.f32 %v742_v42, %v680_v39  ;;  %v780_v53 = vadd.f32 %v779_v43, %v712_v41 }
 0x106   :  { %v957_v54 = vpop.f32.mrf.mxu0  ;;  %v989_v55 = vpop.f32.mrf.mxu1  ;;  %v684_v8 = vmax.f32 %v510_v60, 0.0  ;;  %v716_v9 = vmax.f32 %v638_v61, 0.0 }
 0x107   :  { %v682_v56 = vmax.f32 %v502_v48, 0.0  ;;  %v714_v57 = vmax.f32 %v630_v49, 0.0  ;;  %v744_v58 = vadd.f32 %v743_v51, %v681_v50  ;;  %v781_v59 = vadd.f32 %v780_v53, %v713_v52 }
 0x108   :  { %v514_v62 = vpop.f32.mrf.mxu0  ;;  %v642_v63 = vpop.f32.mrf.mxu1  ;;  %v523_v14 = vadd.f32 %v957_v54, %v1218_v40  ;;  %v651_v15 = vadd.f32 %v989_v55, %v1218_v40 }
 0x109   :  { %v745_v2 = vadd.f32 %v744_v58, %v682_v56  ;;  %v782_v3 = vadd.f32 %v781_v59, %v714_v57  ;;  %v515_v4 = vadd.f32 %v1218_v40, %v514_v62  ;;  %v643_v5 = vadd.f32 %v1218_v40, %v642_v63 }
 0x10a   :  { %v958_v6 = vpop.f32.mrf.mxu0  ;;  %v990_v7 = vpop.f32.mrf.mxu1  ;;  %v687_v28 = vmax.f32 %v523_v14, 0.0  ;;  %v719_v29 = vmax.f32 %v651_v15, 0.0 }
 0x10b   :  { %v746_v10 = vadd.f32 %v745_v2, %v683_v0  ;;  %v783_v11 = vadd.f32 %v782_v3, %v715_v1  ;;  %v685_v18 = vmax.f32 %v515_v4, 0.0  ;;  %v717_v20 = vmax.f32 %v643_v5, 0.0 }
 0x10c   :  { %v517_v12 = vpop.f32.mrf.mxu0  ;;  %v645_v13 = vpop.f32.mrf.mxu1  ;;  %v526_v26 = vadd.f32 %v958_v6, %v1218_v40  ;;  %v654_v27 = vadd.f32 %v990_v7, %v1218_v40 }
 0x10d   :  { %v518_v16 = vadd.f32 %v1218_v40, %v517_v12  ;;  %v646_v17 = vadd.f32 %v1218_v40, %v645_v13  ;;  %v747_v19 = vadd.f32 %v746_v10, %v684_v8  ;;  %v784_v21 = vadd.f32 %v783_v11, %v716_v9 }
 0x10e   :  { %v688_v32 = vmax.f32 %v526_v26, 0.0  ;;  %v720_v33 = vmax.f32 %v654_v27, 0.0 }
 0x10f   :  { %v686_v22 = vmax.f32 %v518_v16, 0.0  ;;  %v718_v23 = vmax.f32 %v646_v17, 0.0  ;;  %v748_v24 = vadd.f32 %v747_v19, %v685_v18  ;;  %v785_v25 = vadd.f32 %v784_v21, %v717_v20 }
 0x111   :  { %v749_v30 = vadd.f32 %v748_v24, %v686_v22  ;;  %v786_v31 = vadd.f32 %v785_v25, %v718_v23 }
 0x113   :  { %v750_v34 = vadd.f32 %v749_v30, %v687_v28  ;;  %v787_v35 = vadd.f32 %v786_v31, %v719_v29 }
 0x115   :  { %v751_v36 = vadd.f32 %v750_v34, %v688_v32  ;;  %v788_v37 = vadd.f32 %v787_v35, %v720_v33 }
 0x117   :  { %v752_v38 = vrot.slane %v751_v36, 4  ;;  %v789_v39 = vrot.slane %v788_v37, 4 }
 0x119   :  { %v753_v41 = vadd.f32 %v752_v38, %v751_v36  ;;  %v790_v42 = vadd.f32 %v789_v39, %v788_v37 }
 0x11b   :  { %v754_v43 = vrot.slane %v753_v41, 2  ;;  %v791_v44 = vrot.slane %v790_v42, 2 }
 0x11d   :  { %v755_v45 = vadd.f32 %v754_v43, %v753_v41  ;;  %v792_v46 = vadd.f32 %v791_v44, %v790_v42 }
 0x11f   :  { %v756_v47 = vrot.slane %v755_v45, 1  ;;  %v793_v40 = vrot.slane %v792_v46, 1 }
 0x121   :  { %v757_v48 = vadd.f32 %v756_v47, %v755_v45  ;;  %v794_v49 = vadd.f32 %v793_v40, %v792_v46 }
 0x123   :  { %v796_v50 = vmul.f32 0.00390625, %v757_v48  ;;  %v797_v51 = vmul.f32 0.00390625, %v794_v49 }
 0x125   :  { %v801_v52 = vsel %vm800_vm2, %v797_v51, %v796_v50 }
 0x126   :  { %803 = vst [vmem:[#allocation2] sm:$0x3] %v801_v52 }
 0x127   :  { %1046 = shalt.err (!%p1043_p4)
}
 0x128   :  { %813 = dma.vmem_to_hbm [thread:$0]  %s811_s2, 32, %s1290_s3, [#allocation3]  }
 0x129   :  { %1055 = dma.done.wait [#allocation3], 32  }
 0x12a   :  { %1056 = vsyncadd [#allocation3], 4294967264 }
 0x12b   :  { %817 = vsyncpa [#allocation3], 1 }

</bundles_post_ra>
